<compile_context>
chip_gen: v7x
topology: tpu7x:2x2x1
jax: 0.10.0
libtpu: 0.0.40
codegen_flags: <defaults>
</compile_context>

<pallas_src>
import functools

import jax
import jax.numpy as jnp
from jax.experimental import pallas as pl
from jax.experimental.pallas import tpu as pltpu


def _round_up(x, m):
    return ((x + m - 1) // m) * m


def aff_kernel(t_ref, w1_ref, b1_ref, w2_ref, b2_ref, o_ref):
    # t_ref: (TB, M, D) bf16 block.  Weights/biases fully VMEM-resident.
    M = t_ref.shape[1]

    # Hoist weight/bias loads (and the bias broadcasts) out of the loop.
    w1 = w1_ref[...]                       # (D, Kp)  bf16
    b1 = b1_ref[...]                       # (1, Kp)  f32
    w2 = w2_ref[...]                       # (Kp, D)  bf16
    b2 = b2_ref[...]                       # (1, D)   f32

    x = t_ref[:, 0, :].astype(jnp.float32)     # (TB, D) f32 carry

    # M is static and small -> fully unrolled Python loop (LLO can interleave
    # MXU pushes, EUP sigmoid and VPU updates across iterations).
    for i in range(1, M):
        y = t_ref[:, i, :].astype(jnp.float32)
        z = (x + y).astype(jnp.bfloat16)
        h = jnp.maximum(
            jnp.dot(z, w1, preferred_element_type=jnp.float32) + b1, 0.0)
        a = jnp.dot(h.astype(jnp.bfloat16), w2,
                    preferred_element_type=jnp.float32) + b2
        w = jax.nn.sigmoid(a)                   # = sigmoid(local + global)
        x = (w * x + (1.0 - w) * y) * 2.0       # f32 elementwise update

    o_ref[...] = x


def _fold_bn(conv_w, conv_b, gamma, beta, mean, var, eps=1e-5):
    """Fold inference-mode BatchNorm1d into a 1x1 Conv1d.

    conv_w: (out, in)  conv_b: (out,)  ->  returns (in, out), (1, out)
    """
    scale = gamma / jnp.sqrt(var + eps)
    w_eff = (conv_w * scale[:, None]).T            # (in, out)
    b_eff = scale * (conv_b - mean) + beta         # (out,)
    return w_eff.astype(jnp.float32), b_eff.reshape(1, -1).astype(jnp.float32)


def make_params(key, dim=128, r=4):
    inter = dim // r
    ks = jax.random.split(key, 16)

    def conv(k, out_c, in_c):
        w = jax.random.normal(k, (out_c, in_c), jnp.float32) * (1.0 / jnp.sqrt(in_c))
        b = jax.random.normal(jax.random.fold_in(k, 1), (out_c,), jnp.float32) * 0.01
        return w, b

    def bn(k, c):
        gamma = 1.0 + 0.1 * jax.random.normal(k, (c,), jnp.float32)
        beta = 0.1 * jax.random.normal(jax.random.fold_in(k, 1), (c,), jnp.float32)
        mean = 0.05 * jax.random.normal(jax.random.fold_in(k, 2), (c,), jnp.float32)
        var = 1.0 + 0.1 * jax.random.uniform(jax.random.fold_in(k, 3), (c,), jnp.float32)
        return gamma, beta, mean, var

    params = {}
    # local branch: conv(dim->inter)+BN(inter), conv(inter->dim)+BN(dim)
    w, b = conv(ks[0], inter, dim)
    params['w1l'], params['b1l'] = _fold_bn(w, b, *bn(ks[1], inter))
    w, b = conv(ks[2], dim, inter)
    params['w2l'], params['b2l'] = _fold_bn(w, b, *bn(ks[3], dim))
    # global branch: same structure, independent params
    w, b = conv(ks[4], inter, dim)
    params['w1g'], params['b1g'] = _fold_bn(w, b, *bn(ks[5], inter))
    w, b = conv(ks[6], dim, inter)
    params['w2g'], params['b2g'] = _fold_bn(w, b, *bn(ks[7], dim))
    return params


def fuse_params(params, lane_pad=128):
    """Concatenate local+global branches into one matmul pair; pad the fused
    intermediate to a lane-dense multiple of 128 (exactly equivalent: padded
    columns have zero weight & bias -> ReLU gives 0 -> zero rows of W2)."""
    w1 = jnp.concatenate([params['w1l'], params['w1g']], axis=1)   # (D, 2I)
    b1 = jnp.concatenate([params['b1l'], params['b1g']], axis=1)   # (1, 2I)
    w2 = jnp.concatenate([params['w2l'], params['w2g']], axis=0)   # (2I, D)
    b2 = params['b2l'] + params['b2g']                             # (1, D)
    k = w1.shape[1]
    kp = _round_up(max(k, lane_pad), lane_pad)
    if kp != k:
        w1 = jnp.pad(w1, ((0, 0), (0, kp - k)))
        b1 = jnp.pad(b1, ((0, 0), (0, kp - k)))
        w2 = jnp.pad(w2, ((0, kp - k), (0, 0)))
    return w1, b1, w2, b2


@functools.partial(jax.jit, static_argnames=("tb",))
def aff_forward(t, params, *, tb=256):
    B, M, D = t.shape

    # Wrapper-side (one-time) param prep: fuse branches, lane-pad, bf16 weights.
    w1, b1, w2, b2 = fuse_params(params)
    w1 = w1.astype(jnp.bfloat16)
    w2 = w2.astype(jnp.bfloat16)
    b1 = b1.astype(jnp.float32)
    b2 = b2.astype(jnp.float32)

    # bf16 activations in HBM/VMEM; f32 math inside the kernel.
    t_bf = t.astype(jnp.bfloat16)

    # Batch tile: multiple of 8 sublanes, capped so double-buffered bf16 input
    # + f32 output stay far under v7x's 64 MiB VMEM (~a few MiB at tb=256).
    tb = min(tb, _round_up(B, 8))
    b_pad = _round_up(B, tb)
    if b_pad != B:
        t_bf = jnp.pad(t_bf, ((0, b_pad - B), (0, 0), (0, 0)))
    grid = (b_pad // tb,)

    kp = w1.shape[1]
    out = pl.pallas_call(
        aff_kernel,
        out_shape=jax.ShapeDtypeStruct((b_pad, D), jnp.float32),
        grid_spec=pltpu.PrefetchScalarGridSpec(
            num_scalar_prefetch=0,
            grid=grid,
            in_specs=[
                pl.BlockSpec((tb, M, D), lambda b: (b, 0, 0)),   # pipelined t tile
                pl.BlockSpec((D, kp), lambda b: (0, 0)),         # fused W1 (resident)
                pl.BlockSpec((1, kp), lambda b: (0, 0)),         # fused b1
                pl.BlockSpec((kp, D), lambda b: (0, 0)),         # fused W2
                pl.BlockSpec((1, D), lambda b: (0, 0)),          # fused b2
            ],
            out_specs=pl.BlockSpec((tb, D), lambda b: (b, 0)),
        ),
        compiler_params=pltpu.CompilerParams(
            dimension_semantics=("parallel",),          # megacore batch split
            vmem_limit_bytes=32 * 1024 * 1024,
        ),
    )(t_bf, w1, b1, w2, b2)
    return out[:B]


def aff_reference(t, params):
    """Pure-JAX reference of the same (BN-folded, eval-mode) forward, using the
    ORIGINAL unfused 4-matmul structure.  Inputs/weights are bf16-rounded to
    match what the kernel stores; math is f32."""
    bf = lambda a: a.astype(jnp.bfloat16).astype(jnp.float32)
    t = bf(t)
    w1l, w2l = bf(params['w1l']), bf(params['w2l'])
    w1g, w2g = bf(params['w1g']), bf(params['w2g'])
    b1l, b2l = params['b1l'], params['b2l']
    b1g, b2g = params['b1g'], params['b2g']
    x = t[:, 0, :]
    for i in range(1, t.shape[1]):
        y = t[:, i, :]
        z = x + y
        al = jnp.maximum(z @ w1l + b1l, 0.0) @ w2l + b2l
        ag = jnp.maximum(z @ w1g + b1g, 0.0) @ w2g + b2g
        w = jax.nn.sigmoid(al + ag)
        x = (w * x + (1.0 - w) * y) * 2.0
    return x


if __name__ == "__main__":
    B, M, DIM, R = 8, 3, 128, 4
    key = jax.random.PRNGKey(0)
    k_t, k_p = jax.random.split(key)
    t = jax.random.normal(k_t, (B, M, DIM), jnp.float32)
    params = make_params(k_p, dim=DIM, r=R)

    out = jax.block_until_ready(aff_forward(t, params))
    ref = aff_reference(t, params)
    assert out.shape == (B, DIM)
    # Tolerance accounts for bf16 rounding of in-kernel intermediates (z, h);
    # inputs/weights are bf16-rounded identically in kernel and reference.
    assert jnp.allclose(out, ref, atol=5e-2, rtol=5e-2), "mismatch vs JAX reference"
    print("KERNEL_OK")
</pallas_src>

<mosaic_0001>
module attributes {stable_mosaic.version = 11 : i64} {
  func.func @aff_kernel(%arg0: i32, %arg1: memref<8x3x128xbf16, #tpu.memory_space<vmem>>, %arg2: memref<128x128xbf16, #tpu.memory_space<vmem>>, %arg3: memref<1x128xf32, #tpu.memory_space<vmem>>, %arg4: memref<128x128xbf16, #tpu.memory_space<vmem>>, %arg5: memref<1x128xf32, #tpu.memory_space<vmem>>, %arg6: memref<8x128xf32, #tpu.memory_space<vmem>>) attributes {dimension_semantics = [#tpu.dimension_semantics<parallel>], iteration_bounds = array<i64: 1>, scalar_prefetch = 0 : i64, scratch_operands = 0 : i64, tpu.core_type = #tpu.core_type<tc>, window_params = [{transform_indices = @transform_0, window_bounds = array<i64: 8, 3, 128>}, {pipeline_mode = #tpu.pipeline_mode<synchronous>, transform_indices = @transform_1, window_bounds = array<i64: 128, 128>}, {pipeline_mode = #tpu.pipeline_mode<synchronous>, transform_indices = @transform_2, window_bounds = array<i64: 1, 128>}, {pipeline_mode = #tpu.pipeline_mode<synchronous>, transform_indices = @transform_3, window_bounds = array<i64: 128, 128>}, {pipeline_mode = #tpu.pipeline_mode<synchronous>, transform_indices = @transform_4, window_bounds = array<i64: 1, 128>}, {transform_indices = @transform_5, window_bounds = array<i64: 8, 128>}]} {
    %c0 = arith.constant 0 : index
    %c0_0 = arith.constant 0 : index
    %0 = vector.load %arg2[%c0, %c0_0] : memref<128x128xbf16, #tpu.memory_space<vmem>>, vector<128x128xbf16>
    %c0_1 = arith.constant 0 : index
    %c0_2 = arith.constant 0 : index
    %1 = vector.load %arg3[%c0_1, %c0_2] : memref<1x128xf32, #tpu.memory_space<vmem>>, vector<1x128xf32>
    %c0_3 = arith.constant 0 : index
    %c0_4 = arith.constant 0 : index
    %2 = vector.load %arg4[%c0_3, %c0_4] : memref<128x128xbf16, #tpu.memory_space<vmem>>, vector<128x128xbf16>
    %c0_5 = arith.constant 0 : index
    %c0_6 = arith.constant 0 : index
    %3 = vector.load %arg5[%c0_5, %c0_6] : memref<1x128xf32, #tpu.memory_space<vmem>>, vector<1x128xf32>
    %c0_7 = arith.constant 0 : index
    %c0_8 = arith.constant 0 : index
    %c0_9 = arith.constant 0 : index
    %4 = vector.load %arg1[%c0_7, %c0_8, %c0_9] : memref<8x3x128xbf16, #tpu.memory_space<vmem>>, vector<8x1x128xbf16>
    %5 = vector.shape_cast %4 : vector<8x1x128xbf16> to vector<8x128xbf16>
    %6 = arith.extf %5 : vector<8x128xbf16> to vector<8x128xf32>
    %c0_10 = arith.constant 0 : index
    %c1 = arith.constant 1 : index
    %c0_11 = arith.constant 0 : index
    %7 = vector.load %arg1[%c0_10, %c1, %c0_11] : memref<8x3x128xbf16, #tpu.memory_space<vmem>>, vector<8x1x128xbf16>
    %8 = vector.shape_cast %7 : vector<8x1x128xbf16> to vector<8x128xbf16>
    %9 = arith.extf %8 : vector<8x128xbf16> to vector<8x128xf32>
    %10 = arith.addf %6, %9 : vector<8x128xf32>
    %11 = arith.truncf %10 : vector<8x128xf32> to vector<8x128xbf16>
    %cst = arith.constant dense<0.000000e+00> : vector<8x128xf32>
    %12 = tpu.matmul %11, %0, %cst {dimension_numbers = #tpu.dot_dimension_numbers<[1], [0], [0], [1], [0, 0, 1, 1], [], []>} : vector<8x128xbf16>, vector<128x128xbf16>, vector<8x128xf32> -> vector<8x128xf32>
    %13 = vector.broadcast %1 : vector<1x128xf32> to vector<8x128xf32>
    %14 = arith.addf %12, %13 : vector<8x128xf32>
    %cst_12 = arith.constant 0.000000e+00 : f32
    %15 = vector.broadcast %cst_12 : f32 to vector<8x128xf32>
    %16 = arith.maximumf %14, %15 : vector<8x128xf32>
    %17 = arith.truncf %16 : vector<8x128xf32> to vector<8x128xbf16>
    %cst_13 = arith.constant dense<0.000000e+00> : vector<8x128xf32>
    %18 = tpu.matmul %17, %2, %cst_13 {dimension_numbers = #tpu.dot_dimension_numbers<[1], [0], [0], [1], [0, 0, 1, 1], [], []>} : vector<8x128xbf16>, vector<128x128xbf16>, vector<8x128xf32> -> vector<8x128xf32>
    %19 = vector.broadcast %3 : vector<1x128xf32> to vector<8x128xf32>
    %20 = arith.addf %18, %19 : vector<8x128xf32>
    %21 = arith.negf %20 : vector<8x128xf32>
    %22 = math.exp %21 : vector<8x128xf32>
    %cst_14 = arith.constant 1.000000e+00 : f32
    %23 = vector.broadcast %cst_14 : f32 to vector<8x128xf32>
    %24 = arith.addf %23, %22 : vector<8x128xf32>
    %25 = arith.divf %23, %24 : vector<8x128xf32>
    %26 = arith.mulf %25, %6 : vector<8x128xf32>
    %cst_15 = arith.constant 1.000000e+00 : f32
    %27 = vector.broadcast %cst_15 : f32 to vector<8x128xf32>
    %28 = arith.subf %27, %25 : vector<8x128xf32>
    %29 = arith.mulf %28, %9 : vector<8x128xf32>
    %30 = arith.addf %26, %29 : vector<8x128xf32>
    %cst_16 = arith.constant 2.000000e+00 : f32
    %31 = vector.broadcast %cst_16 : f32 to vector<8x128xf32>
    %32 = arith.mulf %30, %31 : vector<8x128xf32>
    %c0_17 = arith.constant 0 : index
    %c2 = arith.constant 2 : index
    %c0_18 = arith.constant 0 : index
    %33 = vector.load %arg1[%c0_17, %c2, %c0_18] : memref<8x3x128xbf16, #tpu.memory_space<vmem>>, vector<8x1x128xbf16>
    %34 = vector.shape_cast %33 : vector<8x1x128xbf16> to vector<8x128xbf16>
    %35 = arith.extf %34 : vector<8x128xbf16> to vector<8x128xf32>
    %36 = arith.addf %32, %35 : vector<8x128xf32>
    %37 = arith.truncf %36 : vector<8x128xf32> to vector<8x128xbf16>
    %cst_19 = arith.constant dense<0.000000e+00> : vector<8x128xf32>
    %38 = tpu.matmul %37, %0, %cst_19 {dimension_numbers = #tpu.dot_dimension_numbers<[1], [0], [0], [1], [0, 0, 1, 1], [], []>} : vector<8x128xbf16>, vector<128x128xbf16>, vector<8x128xf32> -> vector<8x128xf32>
    %39 = vector.broadcast %1 : vector<1x128xf32> to vector<8x128xf32>
    %40 = arith.addf %38, %39 : vector<8x128xf32>
    %cst_20 = arith.constant 0.000000e+00 : f32
    %41 = vector.broadcast %cst_20 : f32 to vector<8x128xf32>
    %42 = arith.maximumf %40, %41 : vector<8x128xf32>
    %43 = arith.truncf %42 : vector<8x128xf32> to vector<8x128xbf16>
    %cst_21 = arith.constant dense<0.000000e+00> : vector<8x128xf32>
    %44 = tpu.matmul %43, %2, %cst_21 {dimension_numbers = #tpu.dot_dimension_numbers<[1], [0], [0], [1], [0, 0, 1, 1], [], []>} : vector<8x128xbf16>, vector<128x128xbf16>, vector<8x128xf32> -> vector<8x128xf32>
    %45 = vector.broadcast %3 : vector<1x128xf32> to vector<8x128xf32>
    %46 = arith.addf %44, %45 : vector<8x128xf32>
    %47 = arith.negf %46 : vector<8x128xf32>
    %48 = math.exp %47 : vector<8x128xf32>
    %cst_22 = arith.constant 1.000000e+00 : f32
    %49 = vector.broadcast %cst_22 : f32 to vector<8x128xf32>
    %50 = arith.addf %49, %48 : vector<8x128xf32>
    %51 = arith.divf %49, %50 : vector<8x128xf32>
    %52 = arith.mulf %51, %32 : vector<8x128xf32>
    %cst_23 = arith.constant 1.000000e+00 : f32
    %53 = vector.broadcast %cst_23 : f32 to vector<8x128xf32>
    %54 = arith.subf %53, %51 : vector<8x128xf32>
    %55 = arith.mulf %54, %35 : vector<8x128xf32>
    %56 = arith.addf %52, %55 : vector<8x128xf32>
    %cst_24 = arith.constant 2.000000e+00 : f32
    %57 = vector.broadcast %cst_24 : f32 to vector<8x128xf32>
    %58 = arith.mulf %56, %57 : vector<8x128xf32>
    %c0_25 = arith.constant 0 : index
    %c0_26 = arith.constant 0 : index
    %59 = vector.load %arg6[%c0_25, %c0_26] : memref<8x128xf32, #tpu.memory_space<vmem>>, vector<8x128xf32>
    tpu.vector_store %arg6[%c0_25, %c0_26], %58 {strides = array<i32>} : memref<8x128xf32, #tpu.memory_space<vmem>>, vector<8x128xf32>,
    return
  }
  func.func @transform_0(%arg0: i32) -> (i32, i32, i32) {
    %c0_i32 = arith.constant 0 : i32
    %c0_i32_0 = arith.constant 0 : i32
    %c0_i32_1 = arith.constant 0 : i32
    return %arg0, %c0_i32, %c0_i32_0 : i32, i32, i32
  }
  func.func @transform_1(%arg0: i32) -> (i32, i32) {
    %c0_i32 = arith.constant 0 : i32
    %c0_i32_0 = arith.constant 0 : i32
    %c0_i32_1 = arith.constant 0 : i32
    return %c0_i32, %c0_i32_0 : i32, i32
  }
  func.func @transform_2(%arg0: i32) -> (i32, i32) {
    %c0_i32 = arith.constant 0 : i32
    %c0_i32_0 = arith.constant 0 : i32
    %c0_i32_1 = arith.constant 0 : i32
    return %c0_i32, %c0_i32_0 : i32, i32
  }
  func.func @transform_3(%arg0: i32) -> (i32, i32) {
    %c0_i32 = arith.constant 0 : i32
    %c0_i32_0 = arith.constant 0 : i32
    %c0_i32_1 = arith.constant 0 : i32
    return %c0_i32, %c0_i32_0 : i32, i32
  }
  func.func @transform_4(%arg0: i32) -> (i32, i32) {
    %c0_i32 = arith.constant 0 : i32
    %c0_i32_0 = arith.constant 0 : i32
    %c0_i32_1 = arith.constant 0 : i32
    return %c0_i32, %c0_i32_0 : i32, i32
  }
  func.func @transform_5(%arg0: i32) -> (i32, i32) {
    %c0_i32 = arith.constant 0 : i32
    %c0_i32_0 = arith.constant 0 : i32
    return %arg0, %c0_i32 : i32, i32
  }
}

</mosaic_0001>

<bundles_post_ra>
// kernel: aff_forward.1
= control target key start
LH: loop header
LB: loop body
LE: loop exit
PB: predicated region body
PF: predicated region fallthrough
CT: control target
= control target key end

     0   :  { %v809_v1 = vmov 0.0   ;;  %vm810_vm0 = vmmov 0   ;;  %v355_v14 = vlaneseq  ;;  %vm143_vm1 = vcmask 1041409   ;;  %s1135_s0 = inlined_call_operand.vmem [shape: bf16[8,3,128], index: 0, kind: input, shape index: {}]   ;;  %s1136_s1 = inlined_call_operand.vmem [shape: bf16[128,128], index: 1, kind: input, shape index: {}]   ;;  %s1137_s2 = inlined_call_operand.vmem [shape: f32[1,128], index: 2, kind: input, shape index: {}]   ;;  %s1138_s3 = inlined_call_operand.vmem [shape: bf16[128,128], index: 3, kind: input, shape index: {}]   ;;  %s1139_s4 = inlined_call_operand.vmem [shape: f32[1,128], index: 4, kind: input, shape index: {}]   ;;  %s1140_s5 = inlined_call_operand.hbm [shape: f32[8,128], index: 5, kind: output, shape index: {}]  }
   0x1   :  { %v845_v0 = vld [vmem:[%s1136_s1] sm:$0xff]   ;;  %678 = vmatprep.subr.bf16.mxu0 %v809_v1  ;;  %698 = vmatprep.subr.bf16.mxu1 %v809_v1  ;;  %v853_v2 = vld [vmem:[%s1136_s1 + $0x8] sm:$0xff]   ;;  %v864_v3 = vld [vmem:[%s1136_s1 + $0x10] sm:$0xff]   ;;  %vm146_vm2 = vcmask 1042434   ;;  %vm149_vm3 = vcmask 1043459   ;;  %vm152_vm4 = vcmask 1044484  }
   0x2   :  { %679 = vmatpush3.bf16.msra.mxu0 %v845_v0  ;;  %694 = vmatprep.mubr.msk.bf16.mxu0 %vm810_vm0, %v809_v1  ;;  %v870_v4 = vld [vmem:[%s1136_s1 + $0x18] sm:$0xff]   ;;  %v56_v5 = vld [vmem:[%s1135_s0] sm:$0x1]  ;;  %v57_v6 = vld [vmem:[%s1135_s0 + $0x2] sm:$0x1]  ;;  %vm155_vm5 = vcmask 1045509  }
   0x3   :  { %680 = vmatprep.subr.bf16.mxu0 %v809_v1  ;;  %714 = vmatprep.mubr.msk.bf16.mxu1 %vm810_vm0, %v809_v1  ;;  %v58_v7 = vld [vmem:[%s1135_s0 + $0x4] sm:$0x1]  ;;  %v59_v8 = vld [vmem:[%s1135_s0 + $0x6] sm:$0x1]  ;;  %v60_v9 = vld [vmem:[%s1135_s0 + $0x8] sm:$0x1]  ;;  %v890_v11 = vunpack.c.l.bf16 %v56_v5  ;;  %v892_v12 = vunpack.c.l.bf16 %v57_v6 }
   0x4   :  { %v61_v10 = vld [vmem:[%s1135_s0 + $0xa] sm:$0x1]  ;;  %v894_v13 = vunpack.c.l.bf16 %v58_v7  ;;  %v62_v15 = vld [vmem:[%s1135_s0 + $0xc] sm:$0x1]  ;;  %v63_v16 = vld [vmem:[%s1135_s0 + $0xe] sm:$0x1]  ;;  %v903_v17 = vunpack.c.l.bf16 %v59_v8  ;;  %v905_v18 = vunpack.c.l.bf16 %v60_v9 }
   0x5   :  { %v907_v19 = vunpack.c.l.bf16 %v61_v10  ;;  %v912_v20 = vld [vmem:[%s1138_s3] sm:$0xff]   ;;  %v915_v21 = vunpack.c.l.bf16 %v62_v15  ;;  %v917_v22 = vunpack.c.l.bf16 %v63_v16  ;;  %v614_v23 = vrot.slane %v890_v11, 9  ;;  %v939_v34 = vld [vmem:[%s1138_s3 + $0x8] sm:$0xff]   ;;  %v953_v47 = vld [vmem:[%s1138_s3 + $0x10] sm:$0xff]  }
   0x6   :  { %681 = vmatpush3.bf16.msra.mxu0 %v853_v2  ;;  %v615_v24 = vrot.slane %v892_v12, 9  ;;  %v616_v25 = vrot.slane %v894_v13, 9  ;;  %v617_v26 = vrot.slane %v903_v17, 9  ;;  %v618_v27 = vrot.slane %v905_v18, 9  ;;  %699 = vmatpush3.bf16.msra.mxu1 %v912_v20  ;;  %v929_v29 = vld [vmem:[%s1136_s1 + $0x20] sm:$0xff]   ;;  %v958_v48 = vld [vmem:[%s1136_s1 + $0x28] sm:$0xff]  }
   0x7   :  { %682 = vmatprep.subr.bf16.mxu0 %v809_v1  ;;  %v619_v28 = vrot.slane %v907_v19, 9  ;;  %v620_v30 = vrot.slane %v915_v21, 9  ;;  %v621_v31 = vrot.slane %v917_v22, 9  ;;  %v104_v32 = vadd.f32 %v614_v23, %v890_v11  ;;  %700 = vmatprep.subr.bf16.mxu1 %v809_v1 }
   0x8   :  { %v105_v33 = vadd.f32 %v615_v24, %v892_v12  ;;  %v106_v35 = vadd.f32 %v616_v25, %v894_v13  ;;  %v107_v36 = vadd.f32 %v617_v26, %v903_v17  ;;  %v108_v37 = vadd.f32 %v618_v27, %v905_v18 }
   0x9   :  { %v109_v38 = vadd.f32 %v619_v28, %v907_v19  ;;  %v110_v39 = vadd.f32 %v620_v30, %v915_v21  ;;  %v111_v40 = vadd.f32 %v621_v31, %v917_v22  ;;  %v112_v41 = vpack.c.bf16 %v104_v32, %v104_v32 }
   0xa   :  { %683 = vmatpush3.bf16.msra.mxu0 %v864_v3  ;;  %v113_v42 = vpack.c.bf16 %v105_v33, %v105_v33  ;;  %v114_v43 = vpack.c.bf16 %v106_v35, %v106_v35  ;;  %v115_v44 = vpack.c.bf16 %v107_v36, %v107_v36  ;;  %v116_v45 = vpack.c.bf16 %v108_v37, %v108_v37 }
   0xb   :  { %684 = vmatprep.subr.bf16.mxu0 %v809_v1  ;;  %v117_v46 = vpack.c.bf16 %v109_v38, %v109_v38  ;;  %701 = vmatpush3.bf16.msra.mxu1 %v939_v34  ;;  %v118_v49 = vpack.c.bf16 %v110_v39, %v110_v39  ;;  %v119_v50 = vpack.c.bf16 %v111_v40, %v111_v40  ;;  %v134_v51 = vunpack.c.l.b16 %v112_v41 }
   0xc   :  { %v135_v52 = vunpack.c.l.b16 %v113_v42  ;;  %702 = vmatprep.subr.bf16.mxu1 %v809_v1  ;;  %v136_v53 = vunpack.c.l.b16 %v114_v43  ;;  %v137_v54 = vunpack.c.l.b16 %v115_v44  ;;  %v138_v55 = vunpack.c.l.b16 %v116_v45 }
   0xd   :  { %v139_v56 = vunpack.c.l.b16 %v117_v46  ;;  %v140_v57 = vunpack.c.l.b16 %v118_v49  ;;  %v141_v58 = vunpack.c.l.b16 %v119_v50  ;;  %v963_v60 = vshrl.u32 %v355_v14, 7 }
   0xe   :  { %685 = vmatpush3.bf16.msra.mxu0 %v870_v4  ;;  %v142_v59 = vrot.slane %v135_v52, 7 }
   0xf   :  { %686 = vmatprep.subr.bf16.mxu0 %v809_v1 }
  0x12   :  { %687 = vmatpush3.bf16.msra.mxu0 %v929_v29 }
  0x13   :  { %688 = vmatprep.subr.bf16.mxu0 %v809_v1 }
  0x14   :  { %10 = vsyncpa [#allocation3], 0  ;;  %v145_v61 = vrot.slane %v136_v53, 6  ;;  %v148_v62 = vrot.slane %v137_v54, 5  ;;  %v151_v63 = vrot.slane %v138_v55, 4  ;;  %vm158_vm6 = vcmask 1046534   ;;  %703 = vmatpush3.bf16.msra.mxu1 %v953_v47 }
  0x15   :  { %v969_v5 = vld [vmem:[%s1138_s3 + $0x18] sm:$0xff]   ;;  %v144_v6 = vsel %vm143_vm1, %v142_v59, %v134_v51  ;;  %v154_v7 = vrot.slane %v139_v56, 3  ;;  %vm161_vm7 = vcmask 1047559   ;;  %v357_v8 = vsub.s32 0, %v963_v60  ;;  %704 = vmatprep.subr.bf16.mxu1 %v809_v1  ;;  %v978_v9 = vld [vmem:[%s1136_s1 + $0x30] sm:$0xff]   ;;  %v995_v32 = vld [vmem:[%s1138_s3 + $0x20] sm:$0xff]  }
  0x16   :  { %689 = vmatpush3.bf16.msra.mxu0 %v958_v48  ;;  %v147_v10 = vsel %vm146_vm2, %v145_v61, %v144_v6  ;;  %v157_v14 = vrot.slane %v140_v57, 2  ;;  %v160_v15 = vrot.slane %v141_v58, 1  ;;  %v399_v16 = vsub.s32 1, %v963_v60  ;;  %v768_v38 = vld [vmem:[%s1136_s1 + $0x38] sm:$0xff]  }
  0x17   :  { %690 = vmatprep.subr.bf16.mxu0 %v809_v1  ;;  %v150_v23 = vsel %vm149_vm3, %v148_v62, %v147_v10  ;;  %v358_v24 = vrot.slane %v890_v11, %v357_v8  ;;  %v362_v25 = vrot.slane %v892_v12, %v357_v8  ;;  %v366_v26 = vrot.slane %v894_v13, %v357_v8 }
  0x18   :  { %v153_v27 = vsel %vm152_vm4, %v151_v63, %v150_v23  ;;  %v370_v28 = vrot.slane %v903_v17, %v357_v8  ;;  %v374_v30 = vrot.slane %v905_v18, %v357_v8  ;;  %v378_v31 = vrot.slane %v907_v19, %v357_v8  ;;  %705 = vmatpush3.bf16.msra.mxu1 %v969_v5 }
  0x19   :  { %v156_v33 = vsel %vm155_vm5, %v154_v7, %v153_v27  ;;  %v382_v35 = vrot.slane %v915_v21, %v357_v8  ;;  %v386_v36 = vrot.slane %v917_v22, %v357_v8  ;;  %v387_v37 = vsel %vm143_vm1, %v362_v25, %v358_v24  ;;  %706 = vmatprep.subr.bf16.mxu1 %v809_v1  ;;  %v440_v8 = vld [vmem:[%s1135_s0] sm:$0x2] }
  0x1a   :  { %691 = vmatpush3.bf16.msra.mxu0 %v978_v9  ;;  %v159_v39 = vsel %vm158_vm6, %v157_v14, %v156_v33  ;;  %v388_v40 = vsel %vm146_vm2, %v366_v26, %v387_v37  ;;  %v400_v41 = vrot.slane %v890_v11, %v399_v16  ;;  %v404_v42 = vrot.slane %v892_v12, %v399_v16  ;;  %v774_v11 = vld [vmem:[%s1138_s3 + $0x28] sm:$0xff]  }
  0x1b   :  { %692 = vmatprep.subr.bf16.mxu0 %v809_v1  ;;  %v162_v43 = vsel %vm161_vm7, %v160_v15, %v159_v39  ;;  %v389_v44 = vsel %vm149_vm3, %v370_v28, %v388_v40  ;;  %v408_v45 = vrot.slane %v894_v13, %v399_v16  ;;  %v412_v46 = vrot.slane %v903_v17, %v399_v16  ;;  %v444_v26 = vld [vmem:[%s1135_s0 + $0x8] sm:$0x2]  ;;  %v446_v37 = vld [vmem:[%s1135_s0 + $0xc] sm:$0x2] }
  0x1c   :  { %v390_v49 = vsel %vm152_vm4, %v374_v30, %v389_v44  ;;  %v416_v50 = vrot.slane %v905_v18, %v399_v16  ;;  %707 = vmatpush3.bf16.msra.mxu1 %v995_v32  ;;  %v163_v12 = vpack.c.b16 %v162_v43, %v162_v43  ;;  %v420_v52 = vrot.slane %v907_v19, %v399_v16 }
  0x1d   :  { %v391_v51 = vsel %vm155_vm5, %v378_v31, %v390_v49  ;;  %v429_v53 = vsel %vm143_vm1, %v404_v42, %v400_v41  ;;  %708 = vmatprep.subr.bf16.mxu1 %v809_v1  ;;  %v424_v17 = vrot.slane %v915_v21, %v399_v16  ;;  %v428_v55 = vrot.slane %v917_v22, %v399_v16  ;;  %v443_v16 = vld [vmem:[%s1135_s0 + $0x6] sm:$0x2]  ;;  %v447_v41 = vld [vmem:[%s1135_s0 + $0xe] sm:$0x2] }
  0x1e   :  { %693 = vmatpush3.bf16.msra.mxu0 %v768_v38  ;;  %v392_v13 = vsel %vm158_vm6, %v382_v35, %v391_v51  ;;  %v430_v18 = vsel %vm146_vm2, %v408_v45, %v429_v53  ;;  %v448_v10 = vunpack.c.l.bf16 %v440_v8  ;;  %v466_v15 = vsub.s32 2, %v963_v60  ;;  %v445_v60 = vld [vmem:[%s1135_s0 + $0xa] sm:$0x2] }
  0x1f   :  { %v1029_v54 = vsel %vm161_vm7, %v386_v36, %v392_v13  ;;  %v431_v56 = vsel %vm149_vm3, %v412_v46, %v430_v18  ;;  %718 = vmatprep.subr.bf16.mxu0 %v809_v1  ;;  %v451_v27 = vunpack.c.l.bf16 %v443_v16  ;;  %v452_v33 = vunpack.c.l.bf16 %v444_v26 }
  0x20   :  { %v432_v19 = vsel %vm152_vm4, %v416_v50, %v431_v56  ;;  %709 = vmatpush3.bf16.msra.mxu1 %v774_v11  ;;  %v467_v24 = vrot.slane %v448_v10, %v466_v15  ;;  %v454_v42 = vunpack.c.l.bf16 %v446_v37  ;;  %v455_v45 = vunpack.c.l.bf16 %v447_v41 }
  0x21   :  { %695 = vmatmul.mubr.bf16.vlgmr.msra.gmra.mrb[0].mxu0 %v163_v12  ;;  %v433_v57 = vsel %vm155_vm5, %v420_v52, %v432_v19  ;;  %710 = vmatprep.subr.bf16.mxu1 %v809_v1  ;;  %v479_v35 = vrot.slane %v451_v27, %v466_v15  ;;  %v483_v39 = vrot.slane %v452_v33, %v466_v15 }
  0x22   :  { %v434_v21 = vsel %vm158_vm6, %v424_v17, %v433_v57  ;;  %719 = vmatpush3.bf16.msra.mxu0 %v845_v0  ;;  %734 = vmatprep.mubr.msk.bf16.mxu0 %vm810_vm0, %v809_v1  ;;  %v775_v0 = vld [vmem:[%s1138_s3 + $0x30] sm:$0xff]   ;;  %v491_v46 = vrot.slane %v454_v42, %v466_v15  ;;  %v495_v51 = vrot.slane %v455_v45, %v466_v15 }
  0x23   :  { %v1042_v22 = vsel %vm161_vm7, %v428_v55, %v434_v21  ;;  %720 = vmatprep.subr.bf16.mxu0 %v809_v1 }
  0x24   :  { %711 = vmatpush3.bf16.msra.mxu1 %v775_v0 }
  0x25   :  { %712 = vmatprep.subr.bf16.mxu1 %v809_v1 }
  0x26   :  { %721 = vmatpush3.bf16.msra.mxu0 %v853_v2  ;;  %v776_v2 = vld [vmem:[%s1138_s3 + $0x38] sm:$0xff]  }
  0x27   :  { %722 = vmatprep.subr.bf16.mxu0 %v809_v1 }
  0x28   :  { %713 = vmatpush3.bf16.msra.mxu1 %v776_v2 }
  0x29   :  { %738 = vmatprep.subr.bf16.mxu1 %v809_v1 }
  0x2a   :  { %723 = vmatpush3.bf16.msra.mxu0 %v864_v3  ;;  %v1068_v3 = vld [vmem:[%s1137_s2] ss:$0 sm:$0xff] }
  0x2b   :  { %724 = vmatprep.subr.bf16.mxu0 %v809_v1 }
  0x2e   :  { %725 = vmatpush3.bf16.msra.mxu0 %v870_v4 }
  0x2f   :  { %726 = vmatprep.subr.bf16.mxu0 %v809_v1 }
  0x32   :  { %727 = vmatpush3.bf16.msra.mxu0 %v929_v29 }
  0x33   :  { %728 = vmatprep.subr.bf16.mxu0 %v809_v1 }
  0x36   :  { %729 = vmatpush3.bf16.msra.mxu0 %v958_v48 }
  0x37   :  { %730 = vmatprep.subr.bf16.mxu0 %v809_v1 }
  0x3a   :  { %731 = vmatpush3.bf16.msra.mxu0 %v978_v9  ;;  %v442_v9 = vld [vmem:[%s1135_s0 + $0x4] sm:$0x2] }
  0x3b   :  { %732 = vmatprep.subr.bf16.mxu0 %v809_v1  ;;  %v450_v23 = vunpack.c.l.bf16 %v442_v9 }
  0x3d   :  { %v475_v30 = vrot.slane %v450_v23, %v466_v15 }
  0x3e   :  { %733 = vmatpush3.bf16.msra.mxu0 %v768_v38  ;;  %v453_v38 = vunpack.c.l.bf16 %v445_v60 }
  0x40   :  { %v487_v43 = vrot.slane %v453_v38, %v466_v15 }
  0xf4   :  { %v247_v4 = vpop.f32.mrb[0].mxu0 }
  0xf5   :  { %v248_v29 = vadd.f32 %v1068_v3, %v247_v4  ;;  %v696_v48 = vpop.f32.mrb[1].mxu0 }
  0xf6   :  { %v250_v58 = vpop.f32.mrb[2].mxu0 }
  0xf7   :  { %v253_v59 = vmax.f32 %v248_v29, 0.0  ;;  %v697_v61 = vpop.f32.mrb[3].mxu0 }
  0xf9   :  { %v254_v62 = vpack.c.bf16 %v253_v59, %v253_v59 }
  0xfb   :  { %715 = vmatmul.mubr.bf16.vlgmr.msra.gmra.mrb[0].mxu1 %v254_v62 }
  0xfc   :  { %739 = vmatpush3.bf16.msra.mxu1 %v912_v20  ;;  %754 = vmatprep.mubr.msk.bf16.mxu1 %vm810_vm0, %v809_v1  ;;  %v631_v20 = vld [vmem:[%s1139_s4] ss:$0 sm:$0xff] }
  0xfd   :  { %740 = vmatprep.subr.bf16.mxu1 %v809_v1 }
 0x100   :  { %741 = vmatpush3.bf16.msra.mxu1 %v939_v34 }
 0x101   :  { %742 = vmatprep.subr.bf16.mxu1 %v809_v1 }
 0x104   :  { %743 = vmatpush3.bf16.msra.mxu1 %v953_v47 }
 0x105   :  { %744 = vmatprep.subr.bf16.mxu1 %v809_v1 }
 0x108   :  { %745 = vmatpush3.bf16.msra.mxu1 %v969_v5 }
 0x109   :  { %746 = vmatprep.subr.bf16.mxu1 %v809_v1 }
 0x10c   :  { %747 = vmatpush3.bf16.msra.mxu1 %v995_v32 }
 0x10d   :  { %748 = vmatprep.subr.bf16.mxu1 %v809_v1 }
 0x110   :  { %749 = vmatpush3.bf16.msra.mxu1 %v774_v11 }
 0x111   :  { %750 = vmatprep.subr.bf16.mxu1 %v809_v1 }
 0x114   :  { %751 = vmatpush3.bf16.msra.mxu1 %v775_v0 }
 0x115   :  { %752 = vmatprep.subr.bf16.mxu1 %v809_v1  ;;  %v441_v1 = vld [vmem:[%s1135_s0 + $0x2] sm:$0x2]  ;;  %s811_s0 = smov [#allocation2]  }
 0x116   :  { %v449_v14 = vunpack.c.l.bf16 %v441_v1  ;;  %s606_s7 = sshll.u32 %s811_s0, 4  ;;  %s607_s7 = int_to_ptr.vmem [resolvable:$true] %s606_s7 }
 0x117   :  { %s785_s8 = scalar_lea.vmem %s607_s7, 128  ;;  %p790_p1 = scmp.lt.s32.totalorder %s607_s7, %s607_s7 }
 0x118   :  { %753 = vmatpush3.bf16.msra.mxu1 %v776_v2  ;;  %v471_v25 = vrot.slane %v449_v14, %v466_v15  ;;  %p786_p0 = scmp.ne.s32.totalorder %s607_s7, %s785_s8  ;;  %p791_p2 = scmp.lt.s32.totalorder %s785_s8, %s785_s8 }
 0x11a   :  { %v496_v32 = vsel %vm143_vm1, %v471_v25, %v467_v24  ;;  %p792_p3 = por %p791_p2, %p790_p1 }
 0x11b   :  { %v497_v36 = vsel %vm146_vm2, %v475_v30, %v496_v32 }
 0x11c   :  { %v498_v40 = vsel %vm149_vm3, %v479_v35, %v497_v36  ;;  %p793_p4 = pnand %p792_p3, %p786_p0 }
 0x11d   :  { %v499_v44 = vsel %vm152_vm4, %v483_v39, %v498_v40 }
 0x11e   :  { %v500_v50 = vsel %vm155_vm5, %v487_v43, %v499_v44 }
 0x11f   :  { %v501_v53 = vsel %vm158_vm6, %v491_v46, %v500_v50 }
 0x120   :  { %v502_v17 = vsel %vm161_vm7, %v495_v51, %v501_v53 }
 0x1ce   :  { %v343_v34 = vpop.f32.mrb[0].mxu1 }
 0x1cf   :  { %v344_v47 = vadd.f32 %v631_v20, %v343_v34  ;;  %v716_v63 = vpop.f32.mrb[1].mxu1 }
 0x1d0   :  { %v346_v5 = vpop.f32.mrb[2].mxu1 }
 0x1d1   :  { %v640_v6 = vmul.f32 -1.442695, %v344_v47  ;;  %v717_v7 = vpop.f32.mrb[3].mxu1 }
 0x1d3   :  { %777 = vpow2.f32 %v640_v6 }
 0x1dd   :  { %v778_v28 = vpop.eup %777 }
 0x1de   :  { %v352_v31 = vadd.f32 1.0, %v778_v28 }
 0x1e0   :  { %779 = vrcp.f32 %v352_v31 }
 0x1ea   :  { %v780_v49 = vpop.eup %779 }
 0x1eb   :  { %v395_v11 = vmul.f32 %v780_v49, %v1029_v54  ;;  %v396_v12 = vsub.f32 1.0, %v780_v49 }
 0x1ed   :  { %v437_v52 = vmul.f32 %v1042_v22, %v396_v12 }
 0x1ef   :  { %v438_v13 = vadd.f32 %v437_v52, %v395_v11 }
 0x1f1   :  { %v439_v18 = vmul.f32 2.0, %v438_v13 }
 0x1f3   :  { %v504_v55 = vadd.f32 %v502_v17, %v439_v18 }
 0x1f5   :  { %v505_v56 = vpack.c.bf16 %v504_v55, %v504_v55 }
 0x1f7   :  { %735 = vmatmul.mubr.bf16.vlgmr.msra.gmra.mrb[4].mxu0 %v505_v56 }
 0x2ca   :  { %v540_v19 = vpop.f32.mrb[4].mxu0 }
 0x2cb   :  { %v541_v57 = vadd.f32 %v1068_v3, %v540_v19  ;;  %v736_v21 = vpop.f32.mrb[5].mxu0 }
 0x2cc   :  { %v543_v0 = vpop.f32.mrb[6].mxu0 }
 0x2cd   :  { %v546_v2 = vmax.f32 %v541_v57, 0.0  ;;  %v737_v54 = vpop.f32.mrb[7].mxu0 }
 0x2cf   :  { %v547_v4 = vpack.c.bf16 %v546_v2, %v546_v2 }
 0x2d1   :  { %755 = vmatmul.mubr.bf16.vlgmr.msra.gmra.mrb[4].mxu1 %v547_v4 }
 0x3a4   :  { %v582_v29 = vpop.f32.mrb[4].mxu1 }
 0x3a5   :  { %v583_v22 = vadd.f32 %v631_v20, %v582_v29  ;;  %v756_v48 = vpop.f32.mrb[5].mxu1 }
 0x3a6   :  { %v585_v58 = vpop.f32.mrb[6].mxu1 }
 0x3a7   :  { %v641_v59 = vmul.f32 -1.442695, %v583_v22  ;;  %v757_v61 = vpop.f32.mrb[7].mxu1 }
 0x3a9   :  { %781 = vpow2.f32 %v641_v59 }
 0x3b3   :  { %v782_v62 = vpop.eup %781 }
 0x3b4   :  { %v591_v34 = vadd.f32 1.0, %v782_v62 }
 0x3b6   :  { %783 = vrcp.f32 %v591_v34 }
 0x3c0   :  { %v784_v47 = vpop.eup %783 }
 0x3c1   :  { %v595_v63 = vsub.f32 1.0, %v784_v47  ;;  %v594_v5 = vmul.f32 %v784_v47, %v439_v18 }
 0x3c3   :  { %v596_v3 = vmul.f32 %v595_v63, %v502_v17 }
 0x3c5   :  { %v597_v6 = vadd.f32 %v596_v3, %v594_v5 }
 0x3c7   :  { %v598_v7 = vmul.f32 2.0, %v597_v6 }
 0x3c9   :  { %599 = vst [vmem:[#allocation2] sm:$0xff] %v598_v7 }
 0x3ca   :  { %796 = shalt.err (!%p793_p4)
}
 0x3cb   :  { %s797_s10 = scalar_lea.hbm %s1140_s5, 128 }
 0x3cc   :  { %p798_p5 = scmp.ne.s32.totalorder %s1140_s5, %s797_s10  ;;  %p801_p6 = scmp.lt.u32.totalorder %s797_s10, %s1140_s5 }
 0x3ce   :  { %p803_p7 = pnand %p801_p6, %p798_p5 }
 0x3d0   :  { %806 = shalt.err (!%p803_p7)
}
 0x3d1   :  { %609 = dma.vmem_to_hbm [thread:$0]  %s607_s7, 128, %s1140_s5, [#allocation3]  }
 0x3d2   :  { %807 = dma.done.wait [#allocation3], 128  }
 0x3d3   :  { %808 = vsyncadd [#allocation3], 4294967168 }
 0x3d4   :  { %613 = vsyncpa [#allocation3], 1 }

</bundles_post_ra>
